<compile_context>
chip_gen: v7x
topology: tpu7x:2x2x1
jax: 0.10.0
libtpu: 0.0.40
codegen_flags: <defaults>
</compile_context>

<pallas_src>
import functools

import jax
import jax.numpy as jnp
from jax.experimental import pallas as pl
from jax.experimental.pallas import tpu as pltpu


_OUT_W = 128          # lane-dense width of the single packed output segment
_MASK_NEG = -1e30     # masked-lane logit -> exp underflows to exactly 0


def _seg_softmax(x, seg_mask):
    """Softmax over the lanes selected by seg_mask (others produce exactly 0)."""
    xm = jnp.where(seg_mask, x, _MASK_NEG)
    m = jnp.max(xm, axis=-1, keepdims=True)
    e = jnp.exp(xm - m)                       # masked lanes underflow to 0
    s = jnp.sum(e, axis=-1, keepdims=True)
    r = pl.reciprocal(s, approx=True)         # EUP vrcp slot
    r = r * (2.0 - s * r)                     # one Newton-Raphson step -> ~exact
    return e * r


def _make_kernel(a0, a1):
    """2 x (Linear+ReLU), then one packed head matmul + 2 segmented softmaxes."""

    def _fc_kernel(x_ref,
                   w1_ref, b1_ref,
                   w2_ref, b2_ref,
                   wh_ref, bh_ref,
                   out_ref):
        x = x_ref[...]                                             # bf16

        # fc layer 0: Linear + ReLU (bf16 operands, f32 accumulate)
        h = jnp.dot(x, w1_ref[...],
                    preferred_element_type=jnp.float32) + b1_ref[...]
        h = jnp.maximum(h, 0.0)

        # fc layer 1: Linear + ReLU
        h = jnp.dot(h.astype(jnp.bfloat16), w2_ref[...],
                    preferred_element_type=jnp.float32) + b2_ref[...]
        h = jnp.maximum(h, 0.0)

        # packed heads: ONE MXU N-tile, lane-dense (tile_b, 128) result
        fused = jnp.dot(h.astype(jnp.bfloat16), wh_ref[...],
                        preferred_element_type=jnp.float32) + bh_ref[...]

        lane = jax.lax.broadcasted_iota(jnp.int32, fused.shape, 1)
        seg0 = lane < a0
        seg1 = (lane >= a0) & (lane < a0 + a1)

        # (action_mask is None on this path, so apply_logit_mask is the identity)
        p0 = _seg_softmax(fused, seg0)
        p1 = _seg_softmax(fused, seg1)

        # cols [0,a0) = probs0, [a0,a0+a1) = probs1, col a0+a1 = value, rest = 0
        out_ref[...] = jnp.where(seg0, p0, jnp.where(seg1, p1, fused))

    return _fc_kernel


def _round_up(x, m):
    return ((x + m - 1) // m) * m


def fully_connected_forward(obs, params, *, tile_b=None):
    """
    obs:    (num_envs, num_agents, obs_dim) float32
    params: dict of weights/biases, all (in, out) / (1, out) float32
    Returns: ([probs_head0, probs_head1], vals)
      probs_head_k: (num_envs, num_agents, act_k)
      vals:         (num_envs, num_agents)
    """
    num_envs, num_agents, obs_dim = obs.shape
    B = num_envs * num_agents

    h1 = params["w1"].shape[1]
    h2 = params["w2"].shape[1]
    a0 = params["wh0"].shape[1]
    a1 = params["wh1"].shape[1]
    assert a0 + a1 + 1 <= _OUT_W, "all heads must pack into one 128-lane tile"

    # bf16 matmul operands (f32 accumulation inside the kernel)
    x = obs.reshape(B, obs_dim).astype(jnp.bfloat16)

    # ---- batch-tile selection ------------------------------------------------
    # Big tiles amortize the ~0.35 us per-grid-step overhead; guarantee >=2
    # grid steps when the batch allows so v7x's two TensorCores both get work.
    B8 = _round_up(B, 8)
    if tile_b is None:
        tile_b = min(2048, B8)                     # output is only 128 lanes wide now
        if B8 >= 16 and 2 * tile_b > B8:           # would leave a single grid step
            tile_b = _round_up((B8 + 1) // 2, 8)
    assert tile_b % 8 == 0
    B_pad = _round_up(B, tile_b)
    if B_pad != B:
        x = jnp.pad(x, ((0, B_pad - B), (0, 0)))   # zero rows, sliced off after

    # ---- pack the three heads into one lane-dense (h2, 128) matmul -----------
    wh_packed = jnp.concatenate(
        [params["wh0"], params["wh1"], params["wv"]], axis=1)       # (h2, a0+a1+1)
    bh_packed = jnp.concatenate(
        [params["bh0"], params["bh1"], params["bv"]], axis=1)       # (1, a0+a1+1)
    pad = _OUT_W - (a0 + a1 + 1)
    wh_packed = jnp.pad(wh_packed, ((0, 0), (0, pad)))              # (h2, 128)
    bh_packed = jnp.pad(bh_packed, ((0, 0), (0, pad)))              # (1, 128)

    w1 = params["w1"].astype(jnp.bfloat16)
    w2 = params["w2"].astype(jnp.bfloat16)
    wh = wh_packed.astype(jnp.bfloat16)
    b1 = params["b1"].astype(jnp.float32)
    b2 = params["b2"].astype(jnp.float32)
    bh = bh_packed.astype(jnp.float32)

    n_out = _OUT_W
    grid = (B_pad // tile_b,)

    def full(shape):
        # weights/biases: whole array resident, same block every grid step
        return pl.BlockSpec(shape, lambda i: (0, 0))

    in_specs = [
        pl.BlockSpec((tile_b, obs_dim), lambda i: (i, 0)),
        full((obs_dim, h1)), full((1, h1)),
        full((h1, h2)), full((1, h2)),
        full((h2, n_out)), full((1, n_out)),
    ]
    out_specs = pl.BlockSpec((tile_b, n_out), lambda i: (i, 0))
    out_shape = jax.ShapeDtypeStruct((B_pad, n_out), jnp.float32)

    # ---- scoped-VMEM budget (v5e default is only 16 MiB; v7x physical 64 MiB)
    in_bytes = tile_b * obs_dim * 2                     # bf16 input tile
    out_bytes = tile_b * n_out * 4                      # f32 output tile
    w_bytes = (obs_dim * h1 + h1 * h2 + h2 * n_out) * 2 + (h1 + h2 + n_out) * 4
    vmem_est = 2 * (in_bytes + out_bytes + w_bytes)     # double-buffered tiles
    vmem_est += tile_b * (h1 + h2 + 4 * n_out) * 4      # in-kernel intermediates
    vmem_limit = int(min(max(2 * vmem_est, 16 << 20), 48 << 20))

    # Advisory cost estimate so XLA schedules this custom call sensibly.
    flops = 2 * B_pad * (obs_dim * h1 + h1 * h2 + h2 * n_out)
    bytes_accessed = (B_pad * obs_dim * 2 + B_pad * n_out * 4
                      + (obs_dim * h1 + h1 * h2 + h2 * n_out) * 2
                      + (h1 + h2 + n_out) * 4)
    cost = pl.CostEstimate(flops=flops,
                           transcendentals=B_pad * 2 * n_out,
                           bytes_accessed=bytes_accessed)

    out = pl.pallas_call(
        _make_kernel(a0, a1),
        out_shape=out_shape,
        grid_spec=pltpu.PrefetchScalarGridSpec(
            num_scalar_prefetch=0,
            grid=grid,
            in_specs=in_specs,
            out_specs=out_specs,
        ),
        compiler_params=pltpu.CompilerParams(
            dimension_semantics=("parallel",),
            vmem_limit_bytes=vmem_limit,
        ),
        cost_estimate=cost,
    )(x, w1, b1, w2, b2, wh, bh)

    # contiguous-column slices of the single 128-wide slab
    p0 = out[:B, 0:a0].reshape(num_envs, num_agents, a0)
    p1 = out[:B, a0:a0 + a1].reshape(num_envs, num_agents, a1)
    vals = out[:B, a0 + a1].reshape(num_envs, num_agents)   # vf_head(logits)[..., 0]
    return [p0, p1], vals


def _init_linear(key, fan_in, fan_out):
    """Deterministic init mimicking nn.Linear defaults (uniform +/- 1/sqrt(fan_in))."""
    kw, kb = jax.random.split(key)
    bound = 1.0 / jnp.sqrt(jnp.float32(fan_in))
    w = jax.random.uniform(kw, (fan_in, fan_out), jnp.float32, -bound, bound)
    b = jax.random.uniform(kb, (1, fan_out), jnp.float32, -bound, bound)
    return w, b


def _reference_forward(obs, params):
    """Pure-JAX f32 reference for correctness checking."""
    num_envs, num_agents, obs_dim = obs.shape
    x = obs.reshape(-1, obs_dim)
    h = jnp.maximum(x @ params["w1"] + params["b1"], 0.0)
    h = jnp.maximum(h @ params["w2"] + params["b2"], 0.0)
    l0 = h @ params["wh0"] + params["bh0"]
    l1 = h @ params["wh1"] + params["bh1"]
    p0 = jax.nn.softmax(l0, axis=-1).reshape(num_envs, num_agents, -1)
    p1 = jax.nn.softmax(l1, axis=-1).reshape(num_envs, num_agents, -1)
    v = (h @ params["wv"] + params["bv"])[..., 0].reshape(num_envs, num_agents)
    return [p0, p1], v


if __name__ == "__main__":
    # Small, forward-consistent shapes:
    #   num_envs=2, num_agents=4, flattened_obs_size=16,
    #   fc_dims=[32, 32], MultiDiscrete action space nvec=[5, 7]
    num_envs, num_agents, obs_dim = 2, 4, 16
    fc_dims = [32, 32]
    action_space = [5, 7]

    key = jax.random.PRNGKey(0)
    k_obs, k1, k2, k3, k4, k5 = jax.random.split(key, 6)

    obs = jax.random.normal(k_obs, (num_envs, num_agents, obs_dim), jnp.float32)

    w1, b1 = _init_linear(k1, obs_dim, fc_dims[0])
    w2, b2 = _init_linear(k2, fc_dims[0], fc_dims[1])
    wh0, bh0 = _init_linear(k3, fc_dims[1], action_space[0])
    wh1, bh1 = _init_linear(k4, fc_dims[1], action_space[1])
    wv, bv = _init_linear(k5, fc_dims[1], 1)

    params = dict(w1=w1, b1=b1, w2=w2, b2=b2,
                  wh0=wh0, bh0=bh0, wh1=wh1, bh1=bh1, wv=wv, bv=bv)

    # jit the wrapper so head-packing prep fuses into the same XLA program
    fwd = jax.jit(fully_connected_forward, static_argnames=("tile_b",))

    probs, vals = fwd(obs, params)
    jax.block_until_ready(probs)
    jax.block_until_ready(vals)

    # sanity check against pure-f32 JAX reference (tolerance accounts for the
    # bf16 matmul operands; accumulation is f32, softmax normalization ~exact)
    ref_probs, ref_vals = _reference_forward(obs, params)
    for p, rp in zip(probs, ref_probs):
        assert jnp.allclose(p, rp, atol=2e-2, rtol=2e-2), "policy head mismatch"
    assert jnp.allclose(vals, ref_vals, atol=2e-2, rtol=2e-2), "value head mismatch"
    # probabilities must sum to ~1 per row (NR-refined reciprocal)
    for p in probs:
        assert jnp.allclose(jnp.sum(p, axis=-1), 1.0, atol=1e-5), "softmax norm"

    # TODO(synk): apply_logit_mask with a non-None action_mask (Dict obs with
    # ACTION_MASK key) is not exercised here — with obs passed to forward(),
    # self.action_mask is None, so the mask is the identity.
    print("KERNEL_OK")
</pallas_src>

<mosaic_0001>
module attributes {stable_mosaic.version = 11 : i64} {
  func.func @_fc_kernel(%arg0: i32, %arg1: memref<8x16xbf16, #tpu.memory_space<vmem>>, %arg2: memref<16x32xbf16, #tpu.memory_space<vmem>>, %arg3: memref<1x32xf32, #tpu.memory_space<vmem>>, %arg4: memref<32x32xbf16, #tpu.memory_space<vmem>>, %arg5: memref<1x32xf32, #tpu.memory_space<vmem>>, %arg6: memref<32x128xbf16, #tpu.memory_space<vmem>>, %arg7: memref<1x128xf32, #tpu.memory_space<vmem>>, %arg8: memref<8x128xf32, #tpu.memory_space<vmem>>) attributes {dimension_semantics = [#tpu.dimension_semantics<parallel>], iteration_bounds = array<i64: 1>, scalar_prefetch = 0 : i64, scratch_operands = 0 : i64, tpu.core_type = #tpu.core_type<tc>, window_params = [{transform_indices = @transform_0, window_bounds = array<i64: 8, 16>}, {pipeline_mode = #tpu.pipeline_mode<synchronous>, transform_indices = @transform_1, window_bounds = array<i64: 16, 32>}, {pipeline_mode = #tpu.pipeline_mode<synchronous>, transform_indices = @transform_2, window_bounds = array<i64: 1, 32>}, {pipeline_mode = #tpu.pipeline_mode<synchronous>, transform_indices = @transform_3, window_bounds = array<i64: 32, 32>}, {pipeline_mode = #tpu.pipeline_mode<synchronous>, transform_indices = @transform_4, window_bounds = array<i64: 1, 32>}, {pipeline_mode = #tpu.pipeline_mode<synchronous>, transform_indices = @transform_5, window_bounds = array<i64: 32, 128>}, {pipeline_mode = #tpu.pipeline_mode<synchronous>, transform_indices = @transform_6, window_bounds = array<i64: 1, 128>}, {transform_indices = @transform_7, window_bounds = array<i64: 8, 128>}]} {
    %c0 = arith.constant 0 : index
    %c0_0 = arith.constant 0 : index
    %0 = vector.load %arg1[%c0, %c0_0] : memref<8x16xbf16, #tpu.memory_space<vmem>>, vector<8x16xbf16>
    %c0_1 = arith.constant 0 : index
    %c0_2 = arith.constant 0 : index
    %1 = vector.load %arg2[%c0_1, %c0_2] : memref<16x32xbf16, #tpu.memory_space<vmem>>, vector<16x32xbf16>
    %cst = arith.constant dense<0.000000e+00> : vector<8x32xf32>
    %2 = tpu.matmul %0, %1, %cst {dimension_numbers = #tpu.dot_dimension_numbers<[1], [0], [0], [1], [0, 0, 1, 1], [], []>} : vector<8x16xbf16>, vector<16x32xbf16>, vector<8x32xf32> -> vector<8x32xf32>
    %c0_3 = arith.constant 0 : index
    %c0_4 = arith.constant 0 : index
    %3 = vector.load %arg3[%c0_3, %c0_4] : memref<1x32xf32, #tpu.memory_space<vmem>>, vector<1x32xf32>
    %4 = vector.broadcast %3 : vector<1x32xf32> to vector<8x32xf32>
    %5 = arith.addf %2, %4 : vector<8x32xf32>
    %cst_5 = arith.constant 0.000000e+00 : f32
    %6 = vector.broadcast %cst_5 : f32 to vector<8x32xf32>
    %7 = arith.maximumf %5, %6 : vector<8x32xf32>
    %8 = arith.truncf %7 : vector<8x32xf32> to vector<8x32xbf16>
    %c0_6 = arith.constant 0 : index
    %c0_7 = arith.constant 0 : index
    %9 = vector.load %arg4[%c0_6, %c0_7] : memref<32x32xbf16, #tpu.memory_space<vmem>>, vector<32x32xbf16>
    %cst_8 = arith.constant dense<0.000000e+00> : vector<8x32xf32>
    %10 = tpu.matmul %8, %9, %cst_8 {dimension_numbers = #tpu.dot_dimension_numbers<[1], [0], [0], [1], [0, 0, 1, 1], [], []>} : vector<8x32xbf16>, vector<32x32xbf16>, vector<8x32xf32> -> vector<8x32xf32>
    %c0_9 = arith.constant 0 : index
    %c0_10 = arith.constant 0 : index
    %11 = vector.load %arg5[%c0_9, %c0_10] : memref<1x32xf32, #tpu.memory_space<vmem>>, vector<1x32xf32>
    %12 = vector.broadcast %11 : vector<1x32xf32> to vector<8x32xf32>
    %13 = arith.addf %10, %12 : vector<8x32xf32>
    %cst_11 = arith.constant 0.000000e+00 : f32
    %14 = vector.broadcast %cst_11 : f32 to vector<8x32xf32>
    %15 = arith.maximumf %13, %14 : vector<8x32xf32>
    %16 = arith.truncf %15 : vector<8x32xf32> to vector<8x32xbf16>
    %c0_12 = arith.constant 0 : index
    %c0_13 = arith.constant 0 : index
    %17 = vector.load %arg6[%c0_12, %c0_13] : memref<32x128xbf16, #tpu.memory_space<vmem>>, vector<32x128xbf16>
    %cst_14 = arith.constant dense<0.000000e+00> : vector<8x128xf32>
    %18 = tpu.matmul %16, %17, %cst_14 {dimension_numbers = #tpu.dot_dimension_numbers<[1], [0], [0], [1], [0, 0, 1, 1], [], []>} : vector<8x32xbf16>, vector<32x128xbf16>, vector<8x128xf32> -> vector<8x128xf32>
    %c0_15 = arith.constant 0 : index
    %c0_16 = arith.constant 0 : index
    %19 = vector.load %arg7[%c0_15, %c0_16] : memref<1x128xf32, #tpu.memory_space<vmem>>, vector<1x128xf32>
    %20 = vector.broadcast %19 : vector<1x128xf32> to vector<8x128xf32>
    %21 = arith.addf %18, %20 : vector<8x128xf32>
    %22 = tpu.iota {dimensions = array<i32: 1>} : vector<8x128xi32>
    %c5_i32 = arith.constant 5 : i32
    %23 = vector.broadcast %c5_i32 : i32 to vector<8x128xi32>
    %24 = arith.cmpi slt, %22, %23 : vector<8x128xi32>
    %c5_i32_17 = arith.constant 5 : i32
    %25 = vector.broadcast %c5_i32_17 : i32 to vector<8x128xi32>
    %26 = arith.cmpi sge, %22, %25 : vector<8x128xi32>
    %c12_i32 = arith.constant 12 : i32
    %27 = vector.broadcast %c12_i32 : i32 to vector<8x128xi32>
    %28 = arith.cmpi slt, %22, %27 : vector<8x128xi32>
    %29 = arith.andi %26, %28 : vector<8x128xi1>
    %cst_18 = arith.constant -1.000000e+30 : f32
    %30 = vector.broadcast %cst_18 : f32 to vector<8x128xf32>
    %31 = arith.select %24, %21, %30 : vector<8x128xi1>, vector<8x128xf32>
    %cst_19 = arith.constant dense<0xFF800000> : vector<8xf32>
    %32 = vector.multi_reduction <maximumf>, %31, %cst_19 [1] : vector<8x128xf32> to vector<8xf32>
    %33 = vector.shape_cast %32 : vector<8xf32> to vector<8x1xf32>
    %34 = vector.broadcast %33 : vector<8x1xf32> to vector<8x128xf32>
    %35 = arith.subf %31, %34 : vector<8x128xf32>
    %36 = math.exp %35 : vector<8x128xf32>
    %cst_20 = arith.constant dense<0.000000e+00> : vector<8xf32>
    %37 = vector.multi_reduction <add>, %36, %cst_20 [1] : vector<8x128xf32> to vector<8xf32>
    %38 = vector.shape_cast %37 : vector<8xf32> to vector<8x1xf32>
    %39 = tpu.reciprocal %38 {approx = true} : vector<8x1xf32> -> vector<8x1xf32>
    %40 = arith.mulf %38, %39 : vector<8x1xf32>
    %cst_21 = arith.constant 2.000000e+00 : f32
    %41 = vector.broadcast %cst_21 : f32 to vector<8x1xf32>
    %42 = arith.subf %41, %40 : vector<8x1xf32>
    %43 = arith.mulf %39, %42 : vector<8x1xf32>
    %44 = vector.broadcast %43 : vector<8x1xf32> to vector<8x128xf32>
    %45 = arith.mulf %36, %44 : vector<8x128xf32>
    %cst_22 = arith.constant -1.000000e+30 : f32
    %46 = vector.broadcast %cst_22 : f32 to vector<8x128xf32>
    %47 = arith.select %29, %21, %46 : vector<8x128xi1>, vector<8x128xf32>
    %cst_23 = arith.constant dense<0xFF800000> : vector<8xf32>
    %48 = vector.multi_reduction <maximumf>, %47, %cst_23 [1] : vector<8x128xf32> to vector<8xf32>
    %49 = vector.shape_cast %48 : vector<8xf32> to vector<8x1xf32>
    %50 = vector.broadcast %49 : vector<8x1xf32> to vector<8x128xf32>
    %51 = arith.subf %47, %50 : vector<8x128xf32>
    %52 = math.exp %51 : vector<8x128xf32>
    %cst_24 = arith.constant dense<0.000000e+00> : vector<8xf32>
    %53 = vector.multi_reduction <add>, %52, %cst_24 [1] : vector<8x128xf32> to vector<8xf32>
    %54 = vector.shape_cast %53 : vector<8xf32> to vector<8x1xf32>
    %55 = tpu.reciprocal %54 {approx = true} : vector<8x1xf32> -> vector<8x1xf32>
    %56 = arith.mulf %54, %55 : vector<8x1xf32>
    %cst_25 = arith.constant 2.000000e+00 : f32
    %57 = vector.broadcast %cst_25 : f32 to vector<8x1xf32>
    %58 = arith.subf %57, %56 : vector<8x1xf32>
    %59 = arith.mulf %55, %58 : vector<8x1xf32>
    %60 = vector.broadcast %59 : vector<8x1xf32> to vector<8x128xf32>
    %61 = arith.mulf %52, %60 : vector<8x128xf32>
    %62 = arith.select %29, %61, %21 : vector<8x128xi1>, vector<8x128xf32>
    %63 = arith.select %24, %45, %62 : vector<8x128xi1>, vector<8x128xf32>
    %c0_26 = arith.constant 0 : index
    %c0_27 = arith.constant 0 : index
    %64 = vector.load %arg8[%c0_26, %c0_27] : memref<8x128xf32, #tpu.memory_space<vmem>>, vector<8x128xf32>
    tpu.vector_store %arg8[%c0_26, %c0_27], %63 {strides = array<i32>} : memref<8x128xf32, #tpu.memory_space<vmem>>, vector<8x128xf32>,
    return
  }
  func.func @transform_0(%arg0: i32) -> (i32, i32) {
    %c0_i32 = arith.constant 0 : i32
    %c0_i32_0 = arith.constant 0 : i32
    return %arg0, %c0_i32 : i32, i32
  }
  func.func @transform_1(%arg0: i32) -> (i32, i32) {
    %c0_i32 = arith.constant 0 : i32
    %c0_i32_0 = arith.constant 0 : i32
    %c0_i32_1 = arith.constant 0 : i32
    return %c0_i32, %c0_i32_0 : i32, i32
  }
  func.func @transform_2(%arg0: i32) -> (i32, i32) {
    %c0_i32 = arith.constant 0 : i32
    %c0_i32_0 = arith.constant 0 : i32
    %c0_i32_1 = arith.constant 0 : i32
    return %c0_i32, %c0_i32_0 : i32, i32
  }
  func.func @transform_3(%arg0: i32) -> (i32, i32) {
    %c0_i32 = arith.constant 0 : i32
    %c0_i32_0 = arith.constant 0 : i32
    %c0_i32_1 = arith.constant 0 : i32
    return %c0_i32, %c0_i32_0 : i32, i32
  }
  func.func @transform_4(%arg0: i32) -> (i32, i32) {
    %c0_i32 = arith.constant 0 : i32
    %c0_i32_0 = arith.constant 0 : i32
    %c0_i32_1 = arith.constant 0 : i32
    return %c0_i32, %c0_i32_0 : i32, i32
  }
  func.func @transform_5(%arg0: i32) -> (i32, i32) {
    %c0_i32 = arith.constant 0 : i32
    %c0_i32_0 = arith.constant 0 : i32
    %c0_i32_1 = arith.constant 0 : i32
    return %c0_i32, %c0_i32_0 : i32, i32
  }
  func.func @transform_6(%arg0: i32) -> (i32, i32) {
    %c0_i32 = arith.constant 0 : i32
    %c0_i32_0 = arith.constant 0 : i32
    %c0_i32_1 = arith.constant 0 : i32
    return %c0_i32, %c0_i32_0 : i32, i32
  }
  func.func @transform_7(%arg0: i32) -> (i32, i32) {
    %c0_i32 = arith.constant 0 : i32
    %c0_i32_0 = arith.constant 0 : i32
    return %arg0, %c0_i32 : i32, i32
  }
}

</mosaic_0001>

<bundles_post_ra>
// kernel: squeeze.1
= control target key start
LH: loop header
LB: loop body
LE: loop exit
PB: predicated region body
PF: predicated region fallthrough
CT: control target
= control target key end

     0   :  { %s85_s0 = inlined_call_operand.vmem [shape: f32[8], index: 0, kind: input, shape index: {}]   ;;  %s86_s1 = inlined_call_operand.hbm [shape: f32[2,4], index: 1, kind: output, shape index: {}]  }
   0x1   :  { %v5_v0 = vld [vmem:[%s85_s0] sm:$0x1] }
   0x2   :  { %2 = vsyncpa [#allocation1], 0  ;;  %6 = vst [vmem:[#allocation3] sm:$0x1] %v5_v0  ;;  %vm8_vm0 = vcmask 31744   ;;  %s58_s0 = smov 124  }
   0x3   :  { %s59_s8 = smov [#allocation0]  }
   0x4   :  { %s26_s9 = sshll.u32 %s59_s8, 4  ;;  %s27_s9 = int_to_ptr.vmem [resolvable:$true] %s26_s9 }
   0x5   :  { %s34_s10 = scalar_lea.vmem %s27_s9, 32  ;;  %p39_p1 = scmp.lt.s32.totalorder %s27_s9, %s27_s9 }
   0x6   :  { %p35_p0 = scmp.ne.s32.totalorder %s27_s9, %s34_s10  ;;  %p40_p2 = scmp.lt.s32.totalorder %s34_s10, %s34_s10 }
   0x8   :  { %p41_p3 = por %p40_p2, %p39_p1 }
   0x9   :  { %v10_v1 = vld [vmem:[#allocation3] sm:$0x1]  }
   0xa   :  { %v7_v2 = vld [vmem:[#allocation3] sm:$0x1]   ;;  %11 = vrot.lane.b32.xlu0 %v10_v1, %s58_s0  ;;  %p42_p4 = pnand %p41_p3, %p35_p0 }
   0xb   :  { %9 = vst.msk [vmem:[#allocation2] sm:$0x1] %vm8_vm0, %v7_v2  }
  0x7c   :  { %v12_v3 = vpop.permute.xlu0 %11  }
  0x7d   :  { %15 = vst.msk [vmem:[#allocation2 + $0x1] sm:$0x1] %vm8_vm0, %v12_v3  }
  0x84   :  { %v19_v4 = vld [vmem:[#allocation2] sm:$0x3] }
  0x85   :  { %21 = vst [vmem:[#allocation0] sm:$0x3] %v19_v4 }
  0x86   :  { %45 = shalt.err (!%p42_p4)
}
  0x87   :  { %s46_s13 = scalar_lea.hbm %s86_s1, 32 }
  0x88   :  { %p47_p5 = scmp.ne.s32.totalorder %s86_s1, %s46_s13  ;;  %p50_p6 = scmp.lt.u32.totalorder %s46_s13, %s86_s1 }
  0x8a   :  { %p52_p7 = pnand %p50_p6, %p47_p5 }
  0x8c   :  { %55 = shalt.err (!%p52_p7)
}
  0x8d   :  { %29 = dma.vmem_to_hbm [thread:$0]  %s27_s9, 32, %s86_s1, [#allocation1]  }
  0x8e   :  { %56 = dma.done.wait [#allocation1], 32  }
  0x8f   :  { %57 = vsyncadd [#allocation1], 4294967264 }
  0x90   :  { %31 = vsyncpa [#allocation1], 1 }

// kernel: fully_connected_forward.1
= control target key start
LH: loop header
LB: loop body
LE: loop exit
PB: predicated region body
PF: predicated region fallthrough
CT: control target
= control target key end

     0   :  { %v319_v0 = vmov 0.0   ;;  %vm320_vm0 = vmmov 0   ;;  %vm43_vm1 = vcmask 130048   ;;  %vm112_vm2 = vcmask 261120   ;;  %s401_s1 = inlined_call_operand.vmem [shape: bf16[16,32], index: 1, kind: input, shape index: {}]   ;;  %s402_s0 = inlined_call_operand.vmem [shape: bf16[8,16], index: 0, kind: input, shape index: {}]   ;;  %s403_s3 = inlined_call_operand.vmem [shape: bf16[32,32], index: 3, kind: input, shape index: {}]   ;;  %s404_s5 = inlined_call_operand.vmem [shape: bf16[32,128], index: 5, kind: input, shape index: {}]   ;;  %s405_s2 = inlined_call_operand.vmem [shape: f32[1,32], index: 2, kind: input, shape index: {}]   ;;  %s406_s4 = inlined_call_operand.vmem [shape: f32[1,32], index: 4, kind: input, shape index: {}]   ;;  %s407_s6 = inlined_call_operand.vmem [shape: f32[1,128], index: 6, kind: input, shape index: {}]   ;;  %s408_s7 = inlined_call_operand.vmem [shape: f32[8,128], index: 7, kind: output, shape index: {}]  }
   0x1   :  { %282 = vmatprep.subr.bf16.mxu0 %v319_v0  ;;  %v306_v1 = vld [vmem:[%s401_s1] sm:$0xff]   ;;  %284 = vmatprep.mubr.msk.bf16.mxu0 %vm320_vm0, %v319_v0  ;;  %v308_v4 = vld [vmem:[%s403_s3 + $0x8] sm:$0xff]   ;;  %v224_v23 = vlaneseq }
   0x2   :  { %288 = vmatprep.subr.bf16.mxu1 %v319_v0  ;;  %292 = vmatprep.mubr.msk.bf16.mxu1 %vm320_vm0, %v319_v0  ;;  %v27_v2 = vld [vmem:[%s402_s0] sm:$0xf]  ;;  %v310_v14 = vld [vmem:[%s404_s5 + $0x8] sm:$0xff]  }
   0x3   :  { %283 = vmatpush3.bf16.msra.mxu0 %v306_v1  ;;  %v307_v3 = vld [vmem:[%s403_s3] sm:$0xff]   ;;  %v225_v24 = vand.u32 127, %v224_v23 }
   0x4   :  { %296 = vmatprep.subr.bf16.mxu0 %v319_v0  ;;  %289 = vmatpush3.bf16.msra.mxu1 %v307_v3  ;;  %v309_v5 = vld [vmem:[%s404_s5] sm:$0xff]  }
   0x5   :  { %290 = vmatprep.subr.bf16.mxu1 %v319_v0  ;;  %v263_v6 = vld [vmem:[%s405_s2] ss:$0 sm:$0xff]  ;;  %vm227_vm3 = vcmp.ge.s32.totalorder %v225_v24, 5  ;;  %vm228_vm4 = vcmp.lt.s32.totalorder %v225_v24, 12  ;;  %vm226_vm6 = vcmp.lt.s32.totalorder %v225_v24, 5 }
   0x6   :  { %285 = vmatmul.mubr.msk.bf16.vlgmr.msra.gmra.mrb[0].mxu0 %vm43_vm1, %v27_v2  ;;  %v266_v15 = vld [vmem:[%s406_s4] ss:$0 sm:$0xff]  ;;  %vm388_vm5 = vmand %vm227_vm3, %vm228_vm4 }
   0x7   :  { %300 = vmatprep.mubr.msk.bf16.mxu0 %vm320_vm0, %v319_v0  ;;  %297 = vmatpush3.bf16.msra.mxu0 %v309_v5  ;;  %v270_v25 = vld [vmem:[%s407_s6] ss:$0 sm:$0xff] }
   0x8   :  { %291 = vmatpush3.bf16.msra.mxu1 %v308_v4  ;;  %298 = vmatprep.subr.bf16.mxu0 %v319_v0 }
   0xb   :  { %299 = vmatpush3.bf16.msra.mxu0 %v310_v14 }
  0xd9   :  { %v81_v7 = vpop.f32.mrb[0].mxu0 }
  0xda   :  { %v82_v8 = vadd.f32 %v263_v6, %v81_v7  ;;  %v286_v9 = vpop.f32.mrb[1].mxu0 }
  0xdb   :  { %v84_v10 = vpop.f32.mrb[2].mxu0 }
  0xdc   :  { %v87_v11 = vmax.f32 %v82_v8, 0.0  ;;  %v287_v12 = vpop.f32.mrb[3].mxu0 }
  0xde   :  { %v88_v13 = vpack.c.bf16 %v87_v11, %v87_v11 }
  0xe0   :  { %293 = vmatmul.mubr.msk.bf16.vlgmr.msra.gmra.mrb[0].mxu1 %vm112_vm2, %v88_v13 }
 0x1b3   :  { %v150_v16 = vpop.f32.mrb[0].mxu1 }
 0x1b4   :  { %v151_v17 = vadd.f32 %v266_v15, %v150_v16  ;;  %v294_v18 = vpop.f32.mrb[1].mxu1 }
 0x1b5   :  { %v153_v19 = vpop.f32.mrb[2].mxu1 }
 0x1b6   :  { %v156_v20 = vmax.f32 %v151_v17, 0.0  ;;  %v295_v21 = vpop.f32.mrb[3].mxu1 }
 0x1b8   :  { %v157_v22 = vpack.c.bf16 %v156_v20, %v156_v20 }
 0x1ba   :  { %301 = vmatmul.mubr.msk.bf16.vlgmr.msra.gmra.mrb[4].mxu0 %vm112_vm2, %v157_v22 }
 0x28d   :  { %v218_v26 = vpop.f32.mrb[4].mxu0 }
 0x28e   :  { %v219_v28 = vadd.f32 %v270_v25, %v218_v26  ;;  %v302_v29 = vpop.f32.mrb[5].mxu0 }
 0x28f   :  { %v221_v30 = vpop.f32.mrb[6].mxu0 }
 0x290   :  { %v303_v31 = vpop.f32.mrb[7].mxu0  ;;  %v243_v32 = vsel %vm388_vm5, %v219_v28, -1e+30  ;;  %v230_v33 = vsel %vm226_vm6, %v219_v28, -1e+30 }
 0x291   :  { %244 = vmax.xlane.f32.xlu0 %v243_v32 }
 0x295   :  { %231 = vmax.xlane.f32.xlu0 %v230_v33 }
 0x31e   :  { %v245_v34 = vpop.xlane.xlu0 %244 }
 0x31f   :  { %v246_v35 = vsub.f32 %v243_v32, %v245_v34 }
 0x321   :  { %v247_v36 = vmul.f32 1.442695, %v246_v35 }
 0x322   :  { %v232_v37 = vpop.xlane.xlu0 %231 }
 0x323   :  { %311 = vpow2.f32 %v247_v36  ;;  %v233_v38 = vsub.f32 %v230_v33, %v232_v37 }
 0x325   :  { %v234_v39 = vmul.f32 1.442695, %v233_v38 }
 0x327   :  { %313 = vpow2.f32 %v234_v39 }
 0x32d   :  { %v312_v40 = vpop.eup %311 }
 0x32e   :  { %249 = vadd.xlane.f32.xlu1 %v312_v40 }
 0x331   :  { %v314_v41 = vpop.eup %313 }
 0x332   :  { %236 = vadd.xlane.f32.xlu1 %v314_v41 }
 0x3bb   :  { %v250_v42 = vpop.xlane.xlu1 %249 }
 0x3bc   :  { %315 = vrcp.f32 %v250_v42 }
 0x3bf   :  { %v237_v43 = vpop.xlane.xlu1 %236 }
 0x3c0   :  { %317 = vrcp.f32 %v237_v43 }
 0x3c6   :  { %v316_v44 = vpop.eup %315 }
 0x3c7   :  { %v252_v45 = vmul.f32 %v316_v44, %v250_v42 }
 0x3c9   :  { %v253_v46 = vsub.f32 2.0, %v252_v45 }
 0x3ca   :  { %v318_v47 = vpop.eup %317 }
 0x3cb   :  { %v254_v48 = vmul.f32 %v316_v44, %v253_v46  ;;  %v239_v49 = vmul.f32 %v318_v47, %v237_v43 }
 0x3cd   :  { %v240_v50 = vsub.f32 2.0, %v239_v49  ;;  %v255_v51 = vmul.f32 %v312_v40, %v254_v48 }
 0x3cf   :  { %v241_v52 = vmul.f32 %v318_v47, %v240_v50  ;;  %v256_v54 = vsel %vm388_vm5, %v255_v51, %v219_v28 }
 0x3d1   :  { %v242_v53 = vmul.f32 %v314_v41, %v241_v52 }
 0x3d3   :  { %v257_v55 = vsel %vm226_vm6, %v242_v53, %v256_v54 }
 0x3d4   :  { %258 = vst [vmem:[%s408_s7] sm:$0xff] %v257_v55 }

</bundles_post_ra>
